<compile_context>
chip_gen: v7x
topology: tpu7x:2x2x1
jax: 0.10.0
libtpu: 0.0.40
codegen_flags: <defaults>
</compile_context>

<pallas_src>
import functools

import jax
import jax.numpy as jnp
from jax import lax
from jax.experimental import pallas as pl
from jax.experimental.pallas import tpu as pltpu

_EPS = float(jnp.finfo(jnp.float32).eps)   # matches torch.finfo(torch.float32).eps
_EPS2 = _EPS * _EPS


def _stock_attention_kernel(x_ref, p_ref, o_ref):
    R, H = x_ref.shape            # R = TB * S rows (TB universes of S stocks each)
    TB = o_ref.shape[0]
    S = R // TB

    # One fused MXU matmul: [ v | k | scores ] for all R rows, bias added in f32.
    x = x_ref[...].astype(jnp.float32)                              # bf16 -> f32
    kv = jnp.dot(x, p_ref[0:H, :], preferred_element_type=jnp.float32) + p_ref[H:H + 1, :]
    v = kv[:, 0:H]                                                  # lanes 0..H-1 (output-aligned)
    k = kv[:, H:2 * H]                                              # (R, H)
    s = kv[:, 2 * H:2 * H + 1]                                      # (R, 1)  q . k_i

    # 1 / max(||q|| * ||k_i||, eps)  ==  rsqrt(max(||q||^2 * ||k_i||^2, eps^2))
    qn2 = p_ref[H + 1:H + 2, 0:1]                                   # (1, 1) precomputed ||q||^2
    k2 = jnp.sum(k * k, axis=1, keepdims=True)                      # (R, 1) lane reduce (XLU)
    inv_scale = lax.rsqrt(jnp.maximum(k2 * qn2, jnp.float32(_EPS2)))  # EUP
    att = jnp.maximum(s * inv_scale, 0.0)                           # relu, un-normalized (R, 1)

    # Per-universe sums over S via a block-segment selector matmul (MXU, stays 2-D):
    # sel[t, r] = 1 iff row r belongs to universe t.
    row = lax.broadcasted_iota(jnp.int32, (TB, R), 0)
    col = lax.broadcasted_iota(jnp.int32, (TB, R), 1)
    sel = ((col >= row * S) & (col < (row + 1) * S)).astype(jnp.float32)   # (TB, R)
    hv = jnp.dot(sel, att * v, preferred_element_type=jnp.float32)  # (TB, H)  sum_s att*v
    hs = jnp.dot(sel, att, preferred_element_type=jnp.float32)      # (TB, 1)  sum_s att

    # h_t = (sum att*v) / (sum att + eps): normalizer is a per-universe scalar.
    o_ref[...] = (hv * pl.reciprocal(hs + jnp.float32(_EPS), approx=True)).astype(o_ref.dtype)


def pack_stock_attention_params(q, w_k, b_k, w_v, b_v):
    """Pack all StockAttention parameters into one padded f32 slab (build ONCE, reuse).

    Layout (H = hidden dim, weights stored (in, out)):
      rows 0..H-1 : [ W_v | W_k | w_s ]   with w_s = W_k @ q  (folded q.k score column)
      row  H      : [ b_v | b_k | b_s ]   with b_s = b_k . q
      row  H+1    : [ ||q||^2, 0, ... ]
    padded to (ceil8(H+2), ceil128(2H+1)).
    """
    f32 = jnp.float32
    q, w_k, b_k, w_v, b_v = (a.astype(f32) for a in (q, w_k, b_k, w_v, b_v))
    H = q.shape[0]
    w_s = w_k @ q                                                   # (H,)
    b_s = b_k @ q                                                   # ()
    qn2 = q @ q                                                     # ()
    w_rows = jnp.concatenate([w_v, w_k, w_s[:, None]], axis=1)                    # (H, 2H+1)
    b_row = jnp.concatenate([b_v, b_k, b_s[None]], axis=0)[None, :]               # (1, 2H+1)
    c_row = jnp.concatenate([qn2[None], jnp.zeros((2 * H,), f32)], axis=0)[None, :]
    slab = jnp.concatenate([w_rows, b_row, c_row], axis=0)                        # (H+2, 2H+1)
    rows = -(-(H + 2) // 8) * 8
    cols = -(-(2 * H + 1) // 128) * 128
    return jnp.pad(slab, ((0, rows - slab.shape[0]), (0, cols - slab.shape[1])))


@functools.partial(jax.jit, static_argnames=("tb",))
def stock_attention(x, slab, *, tb=8):
    """Batched StockAttention forward.

    x    : (B, S, H)  B independent stock universes.
    slab : prebuilt parameter slab from pack_stock_attention_params().
    Returns (B, H); row b equals the torch module's forward(x[b]).squeeze(0).
    """
    B, S, H = x.shape
    assert B % tb == 0, "batch must be a multiple of tb (pad the batch)"
    assert S % 8 == 0, "stock_size should be a multiple of 8 (sublane tile)"
    rp, cp = slab.shape

    x2 = x.reshape(B * S, H).astype(jnp.bfloat16)   # stream activations as bf16 (1/2 HBM bytes)

    # VMEM budget per step: 2 x (tb*S*H*2B streamed) + resident slab + tb*H*4B out — tiny here.
    # TODO(synk): at production scale pick the largest tb giving ~0.5-1 MB per x block and
    # re-derive per generation (v7x: 64 MiB physical / ~32 MiB default scoped VMEM).
    return pl.pallas_call(
        _stock_attention_kernel,
        out_shape=jax.ShapeDtypeStruct((B, H), jnp.float32),
        grid=(B // tb,),
        in_specs=[
            pl.BlockSpec((tb * S, H), lambda b: (b, 0)),    # streamed activations
            pl.BlockSpec((rp, cp), lambda b: (0, 0)),       # parameter slab: VMEM-resident
        ],
        out_specs=pl.BlockSpec((tb, H), lambda b: (b, 0)),  # dense (tb, H) output blocks
        compiler_params=pltpu.CompilerParams(
            dimension_semantics=("parallel",)),             # shard batch across v7x's 2 TCs
    )(x2, slab)


def init_params(key, H):
    """Mirror the PyTorch init: q ~ U[0,1); nn.Linear default U(-1/sqrt(H), 1/sqrt(H))."""
    kq, kwk, kbk, kwv, kbv = jax.random.split(key, 5)
    bound = 1.0 / float(jnp.sqrt(jnp.float32(H)))
    q = jax.random.uniform(kq, (H,), jnp.float32)
    w_k = jax.random.uniform(kwk, (H, H), jnp.float32, -bound, bound)   # (in, out)
    b_k = jax.random.uniform(kbk, (H,), jnp.float32, -bound, bound)
    w_v = jax.random.uniform(kwv, (H, H), jnp.float32, -bound, bound)
    b_v = jax.random.uniform(kbv, (H,), jnp.float32, -bound, bound)
    return q, w_k, b_k, w_v, b_v


def _reference(x, q, w_k, b_k, w_v, b_v):
    """Pure-JAX reference mirroring the PyTorch forward for a single (S, H) x."""
    k = x @ w_k + b_k
    v = x @ w_v + b_v
    eps = jnp.finfo(jnp.float32).eps
    scale = jnp.maximum(jnp.linalg.norm(q) * jnp.linalg.norm(k, axis=1), eps)
    att = jax.nn.relu((k @ q) / scale)
    att = att / (att.sum() + eps)
    return (att @ v)[None, :]


if __name__ == "__main__":
    B, S, H = 16, 16, 32   # batch of universes, stock_size, hidden dim

    key = jax.random.PRNGKey(0)
    kx, kp = jax.random.split(key)
    x = jax.random.normal(kx, (B, S, H), jnp.float32)
    q, w_k, b_k, w_v, b_v = init_params(kp, H)

    # Pack parameters ONCE (outside the hot path), then run the batched kernel.
    slab = pack_stock_attention_params(q, w_k, b_k, w_v, b_v)
    h = stock_attention(x, slab, tb=8)
    jax.block_until_ready(h)

    h_ref = jax.vmap(lambda xb: _reference(xb, q, w_k, b_k, w_v, b_v)[0])(x)
    assert h.shape == (B, H)
    # Tolerance dominated by bf16 (2^-9) rounding of the streamed activations.
    assert jnp.allclose(h, h_ref, rtol=1e-2, atol=1e-2)

    print("KERNEL_OK")
</pallas_src>

<mosaic_0001>
module attributes {stable_mosaic.version = 11 : i64} {
  func.func @_stock_attention_kernel(%arg0: i32, %arg1: memref<128x32xbf16, #tpu.memory_space<vmem>>, %arg2: memref<40x128xf32, #tpu.memory_space<vmem>>, %arg3: memref<8x32xf32, #tpu.memory_space<vmem>>) attributes {dimension_semantics = [#tpu.dimension_semantics<parallel>], iteration_bounds = array<i64: 2>, scalar_prefetch = 0 : i64, scratch_operands = 0 : i64, tpu.core_type = #tpu.core_type<tc>, window_params = [{transform_indices = @transform_0, window_bounds = array<i64: 128, 32>}, {pipeline_mode = #tpu.pipeline_mode<synchronous>, transform_indices = @transform_1, window_bounds = array<i64: 40, 128>}, {transform_indices = @transform_2, window_bounds = array<i64: 8, 32>}]} {
    %c0 = arith.constant 0 : index
    %c0_0 = arith.constant 0 : index
    %0 = vector.load %arg1[%c0, %c0_0] : memref<128x32xbf16, #tpu.memory_space<vmem>>, vector<128x32xbf16>
    %1 = arith.extf %0 : vector<128x32xbf16> to vector<128x32xf32>
    %c0_1 = arith.constant 0 : index
    %c0_2 = arith.constant 0 : index
    %2 = vector.load %arg2[%c0_1, %c0_2] : memref<40x128xf32, #tpu.memory_space<vmem>>, vector<32x128xf32>
    %cst = arith.constant dense<0.000000e+00> : vector<128x128xf32>
    %3 = tpu.matmul %1, %2, %cst {dimension_numbers = #tpu.dot_dimension_numbers<[1], [0], [0], [1], [0, 0, 1, 1], [], []>} : vector<128x32xf32>, vector<32x128xf32>, vector<128x128xf32> -> vector<128x128xf32>
    %c32 = arith.constant 32 : index
    %c0_3 = arith.constant 0 : index
    %4 = vector.load %arg2[%c32, %c0_3] : memref<40x128xf32, #tpu.memory_space<vmem>>, vector<1x128xf32>
    %5 = vector.broadcast %4 : vector<1x128xf32> to vector<128x128xf32>
    %6 = arith.addf %3, %5 : vector<128x128xf32>
    %7 = vector.extract_strided_slice %6 {offsets = [0, 0], sizes = [128, 32], strides = [1, 1]} : vector<128x128xf32> to vector<128x32xf32>
    %8 = vector.extract_strided_slice %6 {offsets = [0, 32], sizes = [128, 32], strides = [1, 1]} : vector<128x128xf32> to vector<128x32xf32>
    %9 = vector.extract_strided_slice %6 {offsets = [0, 64], sizes = [128, 1], strides = [1, 1]} : vector<128x128xf32> to vector<128x1xf32>
    %c33 = arith.constant 33 : index
    %c0_4 = arith.constant 0 : index
    %10 = vector.load %arg2[%c33, %c0_4] : memref<40x128xf32, #tpu.memory_space<vmem>>, vector<1x1xf32>
    %11 = arith.mulf %8, %8 : vector<128x32xf32>
    %cst_5 = arith.constant dense<0.000000e+00> : vector<128xf32>
    %12 = vector.multi_reduction <add>, %11, %cst_5 [1] : vector<128x32xf32> to vector<128xf32>
    %13 = vector.shape_cast %12 : vector<128xf32> to vector<128x1xf32>
    %14 = vector.broadcast %10 : vector<1x1xf32> to vector<128x1xf32>
    %15 = arith.mulf %13, %14 : vector<128x1xf32>
    %cst_6 = arith.constant 1.42108547E-14 : f32
    %16 = vector.broadcast %cst_6 : f32 to vector<128x1xf32>
    %17 = arith.maximumf %15, %16 : vector<128x1xf32>
    %18 = math.rsqrt %17 : vector<128x1xf32>
    %19 = arith.mulf %9, %18 : vector<128x1xf32>
    %cst_7 = arith.constant 0.000000e+00 : f32
    %20 = vector.broadcast %cst_7 : f32 to vector<128x1xf32>
    %21 = arith.maximumf %19, %20 : vector<128x1xf32>
    %22 = tpu.iota {dimensions = array<i32: 0>} : vector<8x128xi32>
    %23 = tpu.iota {dimensions = array<i32: 1>} : vector<8x128xi32>
    %c16_i32 = arith.constant 16 : i32
    %24 = vector.broadcast %c16_i32 : i32 to vector<8x128xi32>
    %25 = arith.muli %22, %24 : vector<8x128xi32>
    %26 = arith.cmpi sge, %23, %25 : vector<8x128xi32>
    %c1_i32 = arith.constant 1 : i32
    %27 = vector.broadcast %c1_i32 : i32 to vector<8x128xi32>
    %28 = arith.addi %22, %27 : vector<8x128xi32>
    %c16_i32_8 = arith.constant 16 : i32
    %29 = vector.broadcast %c16_i32_8 : i32 to vector<8x128xi32>
    %30 = arith.muli %28, %29 : vector<8x128xi32>
    %31 = arith.cmpi slt, %23, %30 : vector<8x128xi32>
    %32 = arith.andi %26, %31 : vector<8x128xi1>
    %33 = arith.extui %32 : vector<8x128xi1> to vector<8x128xi32>
    %34 = arith.sitofp %33 : vector<8x128xi32> to vector<8x128xf32>
    %35 = vector.broadcast %21 : vector<128x1xf32> to vector<128x32xf32>
    %36 = arith.mulf %35, %7 : vector<128x32xf32>
    %cst_9 = arith.constant dense<0.000000e+00> : vector<8x32xf32>
    %37 = tpu.matmul %34, %36, %cst_9 {dimension_numbers = #tpu.dot_dimension_numbers<[1], [0], [0], [1], [0, 0, 1, 1], [], []>} : vector<8x128xf32>, vector<128x32xf32>, vector<8x32xf32> -> vector<8x32xf32>
    %cst_10 = arith.constant dense<0.000000e+00> : vector<8x1xf32>
    %38 = tpu.matmul %34, %21, %cst_10 {dimension_numbers = #tpu.dot_dimension_numbers<[1], [0], [0], [1], [0, 0, 1, 1], [], []>} : vector<8x128xf32>, vector<128x1xf32>, vector<8x1xf32> -> vector<8x1xf32>
    %cst_11 = arith.constant 1.1920929E-7 : f32
    %39 = vector.broadcast %cst_11 : f32 to vector<8x1xf32>
    %40 = arith.addf %38, %39 : vector<8x1xf32>
    %41 = tpu.reciprocal %40 {approx = true} : vector<8x1xf32> -> vector<8x1xf32>
    %42 = vector.broadcast %41 : vector<8x1xf32> to vector<8x32xf32>
    %43 = arith.mulf %37, %42 : vector<8x32xf32>
    %c0_12 = arith.constant 0 : index
    %c0_13 = arith.constant 0 : index
    %44 = vector.load %arg3[%c0_12, %c0_13] : memref<8x32xf32, #tpu.memory_space<vmem>>, vector<8x32xf32>
    tpu.vector_store %arg3[%c0_12, %c0_13], %43 {strides = array<i32>} : memref<8x32xf32, #tpu.memory_space<vmem>>, vector<8x32xf32>,
    return
  }
  func.func @transform_0(%arg0: i32) -> (i32, i32) {
    %c0_i32 = arith.constant 0 : i32
    %c0_i32_0 = arith.constant 0 : i32
    return %arg0, %c0_i32 : i32, i32
  }
  func.func @transform_1(%arg0: i32) -> (i32, i32) {
    %c0_i32 = arith.constant 0 : i32
    %c0_i32_0 = arith.constant 0 : i32
    %c0_i32_1 = arith.constant 0 : i32
    return %c0_i32, %c0_i32_0 : i32, i32
  }
  func.func @transform_2(%arg0: i32) -> (i32, i32) {
    %c0_i32 = arith.constant 0 : i32
    %c0_i32_0 = arith.constant 0 : i32
    return %arg0, %c0_i32 : i32, i32
  }
}

</mosaic_0001>

<bundles_post_ra>
// kernel: stock_attention.1
= control target key start
LH: loop header
LB: loop body
LE: loop exit
PB: predicated region body
PF: predicated region fallthrough
CT: control target
= control target key end

     0   :  { %7 = vsyncpa [#allocation3], 0  ;;  %s1891_s0 = inlined_call_operand.vmem [shape: bf16[256,32], index: 0, kind: input, shape index: {}]   ;;  %s1892_s1 = inlined_call_operand.vmem [shape: f32[40,128], index: 1, kind: input, shape index: {}]   ;;  %s1893_s2 = inlined_call_operand.hbm [shape: f32[16,32], index: 2, kind: output, shape index: {}]  }
   0x1   :  { %9 = vsyncpa [#allocation3 + $0x1], 0  ;;  %s1529_s9 = smov 0   ;;  %s1531_s10 = smov 0  }
   0x2   :  { %s1533_s11 = smov 0   ;;  %s1535_s12 = smov 0  }
   0x3 LB: > { %s1550_s13 = sadd.s32 4294967295, %s1503_s12   ;;  %s1033_s14 = sadd.s32 4294967294, %s1503_s12   ;;  %s1503_s12 = sphi %s1535_s12, %s1903_s12   ;;  %s1499_s11 = sphi %s1533_s11, %s1902_s11   ;;  %s1495_s10 = sphi %s1531_s10, %s1901_s10   ;;  %s1491_s9 = sphi %s1529_s9, %s1900_s9  }
   0x4   : > { %s1554_s15 = sadd.s32 1, %s1503_s12   ;;  %s69_s16 = sadd.s32 1, %s1499_s11 }
   0x5   : > { %s66_s17 = ssub.s32 %s1503_s12, %s1554_s15  ;;  %p79_p0 = scmp.ne.s32.totalorder %s1499_s11, %s1495_s10 }
   0x6   : > { %p67_p1 = scmp.eq.s32.totalorder %s66_s17, 0  ;;  %p80_p2 = scmp.eq.s32.totalorder %s1550_s13, 1 }
   0x7   : > { %p85_p3 = scmp.ne.s32.totalorder %s1495_s10, %s1491_s9  ;;  %p86_p4 = scmp.eq.s32.totalorder %s1033_s14, 1 }
   0x8   : > { %s1565_s18 = scalar_select %p67_p1, %s1499_s11, %s69_s16  }
   0x9   : > { %p1567_p5 = por %p80_p2, %p79_p0  ;;  %p1571_p6 = por %p86_p4, %p85_p3 }
   0xa   : > { %p1036_p7 = scmp.ge.s32.totalorder %s1503_s12, 1  ;;  %p116_p8 = scmp.lt.s32.totalorder %s1503_s12, 3 }
   0xc   : > { %p117_p9 = pnand %p1036_p7, %p116_p8 }
   0xd   : > { %v176_v0 = vld [vmem:[%s1892_s1] sm:$0xff] (!%p117_p9)  ;;  %v177_v1 = vld [vmem:[%s1892_s1 + $0x8] sm:$0xff] (!%p117_p9)  ;;  %v178_v2 = vld [vmem:[%s1892_s1 + $0x10] sm:$0xff] (!%p117_p9)  ;;  %s1038_s27 = sshll.u32 (!%p117_p9), %s1550_s13, 4  ;;  %vm185_vm0 = vcmask (!%p117_p9), 261120   ;;  %s1505_s8 = smov (!%p117_p9), 96  }
   0xe   : > { %120 = sbr.rel (%p117_p9) target bundleno = 1163 (0x48b), region = 28  ;;  %v1260_v3 = vpack.c.bf16 (!%p117_p9), %v177_v1, %v176_v0  ;;  %v179_v4 = vld [vmem:[%s1892_s1 + $0x18] sm:$0xff] (!%p117_p9)  ;;  %p139_p10 = scmp.lt.s32.totalorder (!%p117_p9), %s1038_s27, 31  ;;  %v1040_v30 = vld [vmem:[%s1892_s1 + $0x20] ss:$0 sm:$0xff] (!%p117_p9)  ;;  %vm1509_vm1 = vmmov (!%p117_p9), 0  }
   0xf   : > { %v1264_v5 = vpack.c.bf16 (!%p117_p9), %v179_v4, %v178_v2  ;;  %s1506_s17 = smov (!%p117_p9), 64   ;;  %s135_s21 = sand.u32 (!%p117_p9), 1, %s1495_s10  }
  0x10   : > { %1261 = vmatprep.subr.bf16.mxu0 (!%p117_p9), %v1260_v3  ;;  %s1037_s22 = sshll.u32 (!%p117_p9), %s135_s21, 3  ;;  %s1062_s23 = sshll.u32 (!%p117_p9), %s1550_s13, 7 }
  0x11   : > { %1263 = vmatpush3.bf16.msra.mxu0 (!%p117_p9), %v1260_v3  ;;  %s137_s24 = scalar_lea.vmem (!%p117_p9), [#allocation2], %s1037_s22  ;;  %s1848_s28 = scalar_lea.hbm (!%p117_p9), %s1893_s2, %s1062_s23 }
  0x12   : > { %1265 = vmatprep.subr.bf16.mxu0 (!%p117_p9), %v1264_v5  ;;  %s974_s25 = sshll.u32 (!%p117_p9), %s137_s24, 4  ;;  %s961_s29 = scalar_lea.sflag (!%p117_p9), [#allocation3], %s135_s21  ;;  %s1850_s25 = int_to_ptr.vmem [resolvable:$true] %s974_s25 }
  0x13   : > { %s1513_s13 = smov (!%p117_p9), [#allocation2]  }
  0x14   : > { %s1445_s3 = sshll.u32 (!%p117_p9), %s1513_s13, 4  ;;  %s1446_s3 = int_to_ptr.vmem [resolvable:$false] %s1445_s3 }
  0x15   : > { %s1905_s27 = smov (!%p139_p10, %s1038_s27), 31  ;;  %1267 = vmatpush3.bf16.msra.mxu0 %v1264_v5  ;;  %s1447_s4 = scalar_lea.vmem %s1446_s3, 256 }
  0x16   : > { %s1039_s30 = sshll.u32 %s1905_s27, 2  ;;  %p1448_p0 = scmp.lt.s32.totalorder %s1850_s25, %s1446_s3 }
  0x17   : > { %s1593_s5 = scalar_lea.vmem %s1891_s0, %s1039_s30  ;;  %s1441_s30 = scalar_lea.vmem %s1850_s25, 128 }
  0x18   : > { %v1066_v6 = vld [vmem:[%s1593_s5] sm:$0xff]   ;;  %v1097_v7 = vld [vmem:[%s1593_s5 + $0x8] sm:$0xff]   ;;  %v1098_v11 = vld [vmem:[%s1593_s5 + $0x10] sm:$0xff]   ;;  %p1442_p11 = scmp.ne.s32.totalorder %s1850_s25, %s1441_s30  ;;  %p1449_p1 = scmp.lt.s32.totalorder %s1447_s4, %s1441_s30 }
  0x19   : > { %v1067_v8 = vunpack.c.l.bf16 %v1066_v6  ;;  %v1068_v9 = vunpack.c.h.bf16 %v1066_v6  ;;  %v1071_v10 = vunpack.c.l.bf16 %v1097_v7  ;;  %v1072_v12 = vunpack.c.h.bf16 %v1097_v7  ;;  %v1099_v14 = vld [vmem:[%s1593_s5 + $0x18] sm:$0xff]   ;;  %v1100_v17 = vld [vmem:[%s1593_s5 + $0x20] sm:$0xff]   ;;  %v1101_v20 = vld [vmem:[%s1593_s5 + $0x28] sm:$0xff]  }
  0x1a   : > { %v1075_v13 = vunpack.c.l.bf16 %v1098_v11  ;;  %v1076_v15 = vunpack.c.h.bf16 %v1098_v11  ;;  %v1079_v16 = vunpack.c.l.bf16 %v1099_v14  ;;  %v1080_v18 = vunpack.c.h.bf16 %v1099_v14  ;;  %v1102_v23 = vld [vmem:[%s1593_s5 + $0x30] sm:$0xff]   ;;  %v1103_v26 = vld [vmem:[%s1593_s5 + $0x38] sm:$0xff]   ;;  %p1443_p12 = pnand %p1442_p11, %p1567_p5  ;;  %p1450_p2 = por %p1449_p1, %p1448_p0 }
  0x1b   : > { %1166 = vmatprep.mubr.msk.f32.mxu0 %vm185_vm0, %v1067_v8  ;;  %v1083_v19 = vunpack.c.l.bf16 %v1100_v17  ;;  %v1084_v21 = vunpack.c.h.bf16 %v1100_v17  ;;  %v1087_v22 = vunpack.c.l.bf16 %v1101_v20  ;;  %v1088_v24 = vunpack.c.h.bf16 %v1101_v20 }
  0x1c   : > { %1167 = vmatmul.mubr.msk.f32.vlgmr.msra.gmra.mrb[0].mxu0 %vm185_vm0, %v1068_v9  ;;  %v1091_v25 = vunpack.c.l.bf16 %v1102_v23  ;;  %v1092_v27 = vunpack.c.h.bf16 %v1102_v23  ;;  %v1095_v28 = vunpack.c.l.bf16 %v1103_v26  ;;  %v1096_v29 = vunpack.c.h.bf16 %v1103_v26  ;;  %p1444_p13 = pneg %p1443_p12 }
  0x1d   : > { %1169 = vmatprep.mubr.msk.f32.mxu0 %vm185_vm0, %v1071_v10 }
  0x1e   : > { %p1451_p3 = pnand %p1450_p2, %p1444_p13 }
  0x20   : > { %1170 = vmatmul.mubr.msk.f32.gmra.mrb[2].mxu0 %vm185_vm0, %v1072_v12 }
  0x21   : > { %1172 = vmatprep.mubr.msk.f32.mxu0 %vm185_vm0, %v1075_v13 }
  0x24   : > { %1173 = vmatmul.mubr.msk.f32.gmra.mrb[4].mxu0 %vm185_vm0, %v1076_v15 }
  0x25   : > { %1175 = vmatprep.mubr.msk.f32.mxu0 %vm185_vm0, %v1079_v16 }
  0x28   : > { %1176 = vmatmul.mubr.msk.f32.gmra.mrb[6].mxu0 %vm185_vm0, %v1080_v18 }
  0x29   : > { %1178 = vmatprep.mubr.msk.f32.mxu0 %vm185_vm0, %v1083_v19 }
  0x2c   : > { %1179 = vmatmul.mubr.msk.f32.gmra.mrb[8].mxu0 %vm185_vm0, %v1084_v21 }
  0x2d   : > { %1181 = vmatprep.mubr.msk.f32.mxu0 %vm185_vm0, %v1087_v22 }
  0x30   : > { %1182 = vmatmul.mubr.msk.f32.gmra.mrb[10].mxu0 %vm185_vm0, %v1088_v24 }
  0x31   : > { %1184 = vmatprep.mubr.msk.f32.mxu0 %vm185_vm0, %v1091_v25 }
  0x34   : > { %1185 = vmatmul.mubr.msk.f32.gmra.mrb[12].mxu0 %vm185_vm0, %v1092_v27 }
  0x35   : > { %1187 = vmatprep.mubr.msk.f32.mxu0 %vm185_vm0, %v1095_v28 }
  0x38   : > { %1188 = vmatmul.mubr.msk.f32.gmra.mrb[14].mxu0 %vm185_vm0, %v1096_v29 }
  0xef   : > { %v1168_v31 = vpop.f32.mrb[0].mxu0 }
  0xf0   : > { %v300_v32 = vpop.f32.mrb[1].mxu0  ;;  %v1624_v34 = vadd.f32 %v1168_v31, %v1040_v30 }
  0xf1   : > { %v1622_v33 = vadd.f32 %v1040_v30, %v300_v32 }
  0xf2   : > { %v381_v42 = vmul.f32 %v1624_v34, %v1624_v34 }
  0xf3   : > { %v1171_v35 = vpop.f32.mrb[2].mxu0  ;;  %v380_v36 = vmul.f32 %v1622_v33, %v1622_v33 }
  0xf4   : > { %v1628_v37 = vadd.f32 %v1171_v35, %v1040_v30  ;;  %v310_v38 = vpop.f32.mrb[3].mxu0 }
  0xf5   : > { %412 = vrot.lane.b32.xlu0 %v380_v36, %s1505_s8  ;;  %v1631_v39 = vadd.f32 %v1040_v30, %v310_v38 }
  0xf6   : > { %v383_v40 = vmul.f32 %v1628_v37, %v1628_v37 }
  0xf7   : > { %v1174_v41 = vpop.f32.mrb[4].mxu0  ;;  %v382_v46 = vmul.f32 %v1631_v39, %v1631_v39 }
  0xf8   : > { %v1637_v43 = vadd.f32 %v1174_v41, %v1040_v30  ;;  %418 = vrot.lane.b32.xlu1 %v383_v40, %s1505_s8  ;;  %v320_v44 = vpop.f32.mrb[5].mxu0 }
  0xf9   : > { %v1640_v45 = vadd.f32 %v1040_v30, %v320_v44  ;;  %414 = vrot.lane.b32.xlu0 %v381_v42, %s1505_s8 }
  0xfa   : > { %v385_v51 = vmul.f32 %v1637_v43, %v1637_v43 }
  0xfb   : > { %v1177_v47 = vpop.f32.mrb[6].mxu0  ;;  %v384_v48 = vmul.f32 %v1640_v45, %v1640_v45 }
  0xfc   : > { %v1647_v49 = vadd.f32 %v1177_v47, %v1040_v30  ;;  %v330_v50 = vpop.f32.mrb[7].mxu0  ;;  %416 = vrot.lane.b32.xlu1 %v382_v46, %s1505_s8 }
  0xfd   : > { %v1652_v52 = vadd.f32 %v1040_v30, %v330_v50  ;;  %420 = vrot.lane.b32.xlu0 %v384_v48, %s1505_s8 }
  0xfe   : > { %v387_v57 = vmul.f32 %v1647_v49, %v1647_v49 }
  0xff   : > { %v1180_v53 = vpop.f32.mrb[8].mxu0  ;;  %v386_v54 = vmul.f32 %v1652_v52, %v1652_v52 }
 0x100   : > { %v1657_v55 = vadd.f32 %v1180_v53, %v1040_v30  ;;  %v340_v56 = vpop.f32.mrb[9].mxu0  ;;  %422 = vrot.lane.b32.xlu1 %v385_v51, %s1505_s8 }
 0x101   : > { %v1662_v58 = vadd.f32 %v1040_v30, %v340_v56  ;;  %424 = vrot.lane.b32.xlu0 %v386_v54, %s1505_s8  ;;  %v1721_v56 = vld [vmem:[%s1892_s1 + $0x21] ss:$0 sm:$0xff] }
 0x102   : > { %v389_v63 = vmul.f32 %v1657_v55, %v1657_v55 }
 0x103   : > { %v1183_v59 = vpop.f32.mrb[10].mxu0  ;;  %v388_v60 = vmul.f32 %v1662_v58, %v1662_v58 }
 0x104   : > { %v1667_v61 = vadd.f32 %v1183_v59, %v1040_v30  ;;  %v350_v62 = vpop.f32.mrb[11].mxu0  ;;  %426 = vrot.lane.b32.xlu1 %v387_v57, %s1505_s8 }
 0x105   : > { %v1672_v0 = vadd.f32 %v1040_v30, %v350_v62  ;;  %428 = vrot.lane.b32.xlu0 %v388_v60, %s1505_s8 }
 0x106   : > { %v391_v5 = vmul.f32 %v1667_v61, %v1667_v61 }
 0x107   : > { %v1186_v1 = vpop.f32.mrb[12].mxu0  ;;  %v390_v2 = vmul.f32 %v1672_v0, %v1672_v0 }
 0x108   : > { %v1677_v3 = vadd.f32 %v1186_v1, %v1040_v30  ;;  %v360_v4 = vpop.f32.mrb[13].mxu0  ;;  %430 = vrot.lane.b32.xlu1 %v389_v63, %s1505_s8 }
 0x109   : > { %v1682_v6 = vadd.f32 %v1040_v30, %v360_v4  ;;  %432 = vrot.lane.b32.xlu0 %v390_v2, %s1505_s8 }
 0x10a   : > { %v393_v11 = vmul.f32 %v1677_v3, %v1677_v3 }
 0x10b   : > { %v1189_v7 = vpop.f32.mrb[14].mxu0  ;;  %v392_v8 = vmul.f32 %v1682_v6, %v1682_v6 }
 0x10c   : > { %v1687_v9 = vadd.f32 %v1189_v7, %v1040_v30  ;;  %v370_v10 = vpop.f32.mrb[15].mxu0  ;;  %434 = vrot.lane.b32.xlu1 %v391_v5, %s1505_s8 }
 0x10d   : > { %v1692_v12 = vadd.f32 %v1040_v30, %v370_v10  ;;  %436 = vrot.lane.b32.xlu0 %v392_v8, %s1505_s8 }
 0x10e   : > { %v395_v14 = vmul.f32 %v1687_v9, %v1687_v9 }
 0x10f   : > { %v394_v13 = vmul.f32 %v1692_v12, %v1692_v12 }
 0x110   : > { %438 = vrot.lane.b32.xlu1 %v393_v11, %s1505_s8 }
 0x111   : > { %440 = vrot.lane.b32.xlu0 %v394_v13, %s1505_s8 }
 0x114   : > { %442 = vrot.lane.b32.xlu1 %v395_v14, %s1505_s8 }
 0x167   : > { %v413_v15 = vpop.permute.xlu0 %412 }
 0x168   : > { %v460_v16 = vsel %vm185_vm0, %v413_v15, 0.0 }
 0x169   : > { %461 = vadd.xlane.f32.xlu0 %v460_v16 }
 0x16a   : > { %v419_v17 = vpop.permute.xlu1 %418 }
 0x16b   : > { %v415_v18 = vpop.permute.xlu0 %414  ;;  %v469_v19 = vsel %vm185_vm0, %v419_v17, 0.0 }
 0x16c   : > { %v463_v20 = vsel %vm185_vm0, %v415_v18, 0.0 }
 0x16d   : > { %470 = vadd.xlane.f32.xlu0 %v469_v19  ;;  %464 = vadd.xlane.f32.xlu1 %v463_v20 }
 0x16e   : > { %v417_v21 = vpop.permute.xlu1 %416 }
 0x16f   : > { %v421_v22 = vpop.permute.xlu0 %420  ;;  %v466_v23 = vsel %vm185_vm0, %v417_v21, 0.0 }
 0x170   : > { %v472_v24 = vsel %vm185_vm0, %v421_v22, 0.0 }
 0x171   : > { %467 = vadd.xlane.f32.xlu0 %v466_v23  ;;  %473 = vadd.xlane.f32.xlu1 %v472_v24 }
 0x172   : > { %v423_v25 = vpop.permute.xlu1 %422 }
 0x173   : > { %v425_v26 = vpop.permute.xlu0 %424  ;;  %v475_v27 = vsel %vm185_vm0, %v423_v25, 0.0 }
 0x174   : > { %v478_v28 = vsel %vm185_vm0, %v425_v26, 0.0 }
 0x175   : > { %476 = vadd.xlane.f32.xlu0 %v475_v27  ;;  %479 = vadd.xlane.f32.xlu1 %v478_v28 }
 0x176   : > { %v427_v29 = vpop.permute.xlu1 %426 }
 0x177   : > { %v429_v30 = vpop.permute.xlu0 %428  ;;  %v481_v31 = vsel %vm185_vm0, %v427_v29, 0.0 }
 0x178   : > { %v484_v32 = vsel %vm185_vm0, %v429_v30, 0.0 }
 0x179   : > { %482 = vadd.xlane.f32.xlu0 %v481_v31  ;;  %485 = vadd.xlane.f32.xlu1 %v484_v32 }
 0x17a   : > { %v431_v35 = vpop.permute.xlu1 %430 }
 0x17b   : > { %v433_v36 = vpop.permute.xlu0 %432  ;;  %v487_v38 = vsel %vm185_vm0, %v431_v35, 0.0 }
 0x17c   : > { %v490_v40 = vsel %vm185_vm0, %v433_v36, 0.0 }
 0x17d   : > { %488 = vadd.xlane.f32.xlu0 %v487_v38  ;;  %491 = vadd.xlane.f32.xlu1 %v490_v40 }
 0x17e   : > { %v435_v41 = vpop.permute.xlu1 %434 }
 0x17f   : > { %v437_v42 = vpop.permute.xlu0 %436  ;;  %v493_v44 = vsel %vm185_vm0, %v435_v41, 0.0 }
 0x180   : > { %v496_v46 = vsel %vm185_vm0, %v437_v42, 0.0 }
 0x181   : > { %494 = vadd.xlane.f32.xlu0 %v493_v44  ;;  %497 = vadd.xlane.f32.xlu1 %v496_v46 }
 0x182   : > { %v439_v47 = vpop.permute.xlu1 %438 }
 0x183   : > { %v441_v48 = vpop.permute.xlu0 %440  ;;  %v499_v50 = vsel %vm185_vm0, %v439_v47, 0.0 }
 0x184   : > { %v502_v51 = vsel %vm185_vm0, %v441_v48, 0.0 }
 0x185   : > { %500 = vadd.xlane.f32.xlu0 %v499_v50  ;;  %503 = vadd.xlane.f32.xlu1 %v502_v51 }
 0x186   : > { %v443_v53 = vpop.permute.xlu1 %442 }
 0x187   : > { %v505_v54 = vsel %vm185_vm0, %v443_v53, 0.0 }
 0x189   : > { %506 = vadd.xlane.f32.xlu0 %v505_v54 }
 0x1f6   : > { %v462_v57 = vpop.xlane.xlu0 %461 }
 0x1f7   : > { %v512_v59 = vmul.f32 %v1721_v56, %v462_v57 }
 0x1f9   : > { %v528_v60 = vmax.f32 %v512_v59, 1.4210855e-14 }
 0x1fa   : > { %v465_v62 = vpop.xlane.xlu1 %464  ;;  %v471_v63 = vpop.xlane.xlu0 %470 }
 0x1fb   : > { %1407 = vrsqrt.f32 %v528_v60  ;;  %v513_v1 = vmul.f32 %v1721_v56, %v465_v62  ;;  %v515_v2 = vmul.f32 %v1721_v56, %v471_v63 }
 0x1fd   : > { %v529_v4 = vmax.f32 %v513_v1, 1.4210855e-14  ;;  %v531_v5 = vmax.f32 %v515_v2, 1.4210855e-14 }
 0x1fe   : > { %v474_v7 = vpop.xlane.xlu1 %473  ;;  %v468_v8 = vpop.xlane.xlu0 %467 }
 0x1ff   : > { %1409 = vrsqrt.f32 %v529_v4  ;;  %v516_v10 = vmul.f32 %v1721_v56, %v474_v7  ;;  %v514_v11 = vmul.f32 %v1721_v56, %v468_v8 }
 0x200   : > { %1411 = vrsqrt.f32 %v531_v5 }
 0x201   : > { %v532_v13 = vmax.f32 %v516_v10, 1.4210855e-14  ;;  %v530_v14 = vmax.f32 %v514_v11, 1.4210855e-14 }
 0x202   : > { %v480_v15 = vpop.xlane.xlu1 %479  ;;  %v477_v16 = vpop.xlane.xlu0 %476 }
 0x203   : > { %1413 = vrsqrt.f32 %v532_v13  ;;  %v518_v17 = vmul.f32 %v1721_v56, %v480_v15  ;;  %v517_v18 = vmul.f32 %v1721_v56, %v477_v16 }
 0x204   : > { %1415 = vrsqrt.f32 %v530_v14  ;;  %v1507_v14 = vmov 64  }
 0x205   : > { %v1408_v19 = vpop.eup %1407  ;;  %v534_v20 = vmax.f32 %v518_v17, 1.4210855e-14  ;;  %v533_v21 = vmax.f32 %v517_v18, 1.4210855e-14  ;;  %1403 = vset.pattern.permute.xlu0 %v1507_v14  ;;  %1404 = vset.pattern.permute.xlu1 %v1507_v14  ;;  %v1508_v18 = vmov 0.0|0.0  }
 0x206   : > { %v486_v22 = vpop.xlane.xlu1 %485  ;;  %576 = vrot.lane.b32.xlu1 %v1408_v19, %s1506_s17  ;;  %v483_v23 = vpop.xlane.xlu0 %482  ;;  %1292 = vmatprep.subr.bf16.mxu0 %v1508_v18 }
 0x207   : > { %1417 = vrsqrt.f32 %v534_v20  ;;  %v520_v24 = vmul.f32 %v1721_v56, %v486_v22  ;;  %v519_v25 = vmul.f32 %v1721_v56, %v483_v23  ;;  %1268 = vmatprep.subr.bf16.mxu1 %v1508_v18 }
 0x208   : > { %1419 = vrsqrt.f32 %v533_v21 }
 0x209   : > { %v1410_v26 = vpop.eup %1409  ;;  %v536_v27 = vmax.f32 %v520_v24, 1.4210855e-14  ;;  %v535_v28 = vmax.f32 %v519_v25, 1.4210855e-14 }
 0x20a   : > { %v1412_v29 = vpop.eup %1411  ;;  %578 = vrot.lane.b32.xlu0 %v1410_v26, %s1506_s17  ;;  %v492_v30 = vpop.xlane.xlu1 %491 }
 0x20b   : > { %v489_v31 = vpop.xlane.xlu0 %488  ;;  %1421 = vrsqrt.f32 %v536_v27  ;;  %v522_v32 = vmul.f32 %v1721_v56, %v492_v30  ;;  %582 = vrot.lane.b32.xlu1 %v1412_v29, %s1506_s17 }
 0x20c   : > { %v521_v35 = vmul.f32 %v1721_v56, %v489_v31  ;;  %1423 = vrsqrt.f32 %v535_v28 }
 0x20d   : > { %v1414_v36 = vpop.eup %1413  ;;  %v538_v38 = vmax.f32 %v522_v32, 1.4210855e-14 }
 0x20e   : > { %v537_v40 = vmax.f32 %v521_v35, 1.4210855e-14  ;;  %v1416_v41 = vpop.eup %1415  ;;  %584 = vrot.lane.b32.xlu0 %v1414_v36, %s1506_s17  ;;  %v498_v42 = vpop.xlane.xlu1 %497 }
 0x20f   : > { %v495_v44 = vpop.xlane.xlu0 %494  ;;  %1425 = vrsqrt.f32 %v538_v38  ;;  %v524_v46 = vmul.f32 %v1721_v56, %v498_v42  ;;  %580 = vrot.lane.b32.xlu1 %v1416_v41, %s1506_s17 }
 0x210   : > { %v523_v47 = vmul.f32 %v1721_v56, %v495_v44  ;;  %1427 = vrsqrt.f32 %v537_v40 }
 0x211   : > { %v1418_v48 = vpop.eup %1417  ;;  %v540_v50 = vmax.f32 %v524_v46, 1.4210855e-14 }
 0x212   : > { %v539_v51 = vmax.f32 %v523_v47, 1.4210855e-14  ;;  %v1420_v53 = vpop.eup %1419  ;;  %588 = vrot.lane.b32.xlu0 %v1418_v48, %s1506_s17  ;;  %v504_v54 = vpop.xlane.xlu1 %503 }
 0x213   : > { %v501_v57 = vpop.xlane.xlu0 %500  ;;  %1429 = vrsqrt.f32 %v540_v50  ;;  %v526_v59 = vmul.f32 %v1721_v56, %v504_v54  ;;  %586 = vrot.lane.b32.xlu1 %v1420_v53, %s1506_s17 }
 0x214   : > { %v525_v60 = vmul.f32 %v1721_v56, %v501_v57  ;;  %1431 = vrsqrt.f32 %v539_v51 }
 0x215   : > { %v1422_v62 = vpop.eup %1421  ;;  %v542_v63 = vmax.f32 %v526_v59, 1.4210855e-14 }
 0x216   : > { %v541_v1 = vmax.f32 %v525_v60, 1.4210855e-14  ;;  %v1424_v2 = vpop.eup %1423  ;;  %592 = vrot.lane.b32.xlu0 %v1422_v62, %s1506_s17 }
 0x217   : > { %v507_v4 = vpop.xlane.xlu0 %506  ;;  %1433 = vrsqrt.f32 %v542_v63  ;;  %590 = vrot.lane.b32.xlu1 %v1424_v2, %s1506_s17 }
 0x218   : > { %v527_v5 = vmul.f32 %v1721_v56, %v507_v4  ;;  %1435 = vrsqrt.f32 %v541_v1 }
 0x219   : > { %v1426_v7 = vpop.eup %1425 }
 0x21a   : > { %v543_v8 = vmax.f32 %v527_v5, 1.4210855e-14  ;;  %v1428_v10 = vpop.eup %1427  ;;  %596 = vrot.lane.b32.xlu0 %v1426_v7, %s1506_s17 }
 0x21b   : > { %594 = vrot.lane.b32.xlu1 %v1428_v10, %s1506_s17 }
 0x21c   : > { %1437 = vrsqrt.f32 %v543_v8 }
 0x21d   : > { %v1430_v11 = vpop.eup %1429 }
 0x21e   : > { %v1432_v13 = vpop.eup %1431  ;;  %600 = vrot.lane.b32.xlu0 %v1430_v11, %s1506_s17 }
 0x21f   : > { %598 = vrot.lane.b32.xlu1 %v1432_v13, %s1506_s17 }
 0x221   : > { %v1434_v15 = vpop.eup %1433 }
 0x222   : > { %v1436_v56 = vpop.eup %1435  ;;  %604 = vrot.lane.b32.xlu0 %v1434_v15, %s1506_s17 }
 0x223   : > { %602 = vrot.lane.b32.xlu1 %v1436_v56, %s1506_s17 }
 0x226   : > { %v1438_v16 = vpop.eup %1437 }
 0x227   : > { %606 = vrot.lane.b32.xlu1 %v1438_v16, %s1506_s17 }
 0x278   : > { %v577_v17 = vpop.permute.xlu1 %576 }
 0x279   : > { %v1758_v19 = vmul.f32 %v577_v17, %v1622_v33 }
 0x27b   : > { %v640_v23 = vmax.f32 %v1758_v19, 0.0 }
 0x27c   : > { %v579_v20 = vpop.permute.xlu0 %578 }
 0x27d   : > { %v583_v21 = vpop.permute.xlu1 %582  ;;  %v1761_v22 = vmul.f32 %v579_v20, %v1624_v34 }
 0x27e   : > { %v627_v25 = vmul.f32 %v583_v21, %v1628_v37  ;;  %v1510_v21 = vmov 0.0  }
 0x27f   : > { %v641_v24 = vmax.f32 %v1761_v22, 0.0  ;;  %1257 = vmatprep.mubr.msk.f32.mxu0 %vm1509_vm1, %v1510_v21  ;;  %1222 = vmatprep.mubr.msk.f32.mxu1 %vm1509_vm1, %v1510_v21  ;;  %v1511_v21 = vmov 1.0  }
 0x280   : > { %v585_v26 = vpop.permute.xlu0 %584  ;;  %v643_v30 = vmax.f32 %v627_v25, 0.0 }
 0x281   : > { %v1363_v27 = vpack.i.bf16 %v641_v24, %v640_v23  ;;  %v581_v28 = vpop.permute.xlu1 %580  ;;  %v628_v32 = vmul.f32 %v585_v26, %v1640_v45 }
 0x282   : > { %v626_v29 = vmul.f32 %v581_v28, %v1631_v39 }
 0x283   : > { %1364 = vrot.lane.b32.xlu0 %v1363_v27, %s1506_s17  ;;  %v644_v41 = vmax.f32 %v628_v32, 0.0 }
 0x284   : > { %v642_v31 = vmax.f32 %v626_v29, 0.0  ;;  %v589_v35 = vpop.permute.xlu0 %588 }
 0x285   : > { %v587_v36 = vpop.permute.xlu1 %586  ;;  %v630_v44 = vmul.f32 %v589_v35, %v1652_v52 }
 0x286   : > { %v1368_v38 = vpack.i.bf16 %v643_v30, %v642_v31  ;;  %v629_v40 = vmul.f32 %v587_v36, %v1637_v43 }
 0x287   : > { %v646_v51 = vmax.f32 %v630_v44, 0.0 }
 0x288   : > { %v645_v42 = vmax.f32 %v629_v40, 0.0  ;;  %1369 = vrot.lane.b32.xlu1 %v1368_v38, %s1506_s17  ;;  %v593_v46 = vpop.permute.xlu0 %592 }
 0x289   : > { %v591_v47 = vpop.permute.xlu1 %590  ;;  %v632_v54 = vmul.f32 %v593_v46, %v1662_v58 }
 0x28a   : > { %v1373_v48 = vpack.i.bf16 %v645_v42, %v644_v41  ;;  %v631_v50 = vmul.f32 %v591_v47, %v1647_v49 }
 0x28b   : > { %v648_v63 = vmax.f32 %v632_v54, 0.0 }
 0x28c   : > { %v647_v53 = vmax.f32 %v631_v50, 0.0  ;;  %1374 = vrot.lane.b32.xlu0 %v1373_v48, %s1506_s17  ;;  %v597_v57 = vpop.permute.xlu0 %596  ;;  %v656_v50 = vlaneseq }
 0x28d   : > { %v595_v59 = vpop.permute.xlu1 %594  ;;  %v634_v2 = vmul.f32 %v597_v57, %v1672_v0 }
 0x28e   : > { %v1378_v60 = vpack.i.bf16 %v647_v53, %v646_v51  ;;  %v633_v62 = vmul.f32 %v595_v59, %v1657_v55  ;;  %v657_v59 = vshrl.u32 %v656_v50, 7 }
 0x28f   : > { %v650_v10 = vmax.f32 %v634_v2, 0.0 }
 0x290   : > { %v649_v1 = vmax.f32 %v633_v62, 0.0  ;;  %1379 = vrot.lane.b32.xlu1 %v1378_v60, %s1506_s17  ;;  %v601_v4 = vpop.permute.xlu0 %600  ;;  %v662_v2 = vadd.s32 1, %v657_v59 }
 0x291   : > { %v599_v5 = vpop.permute.xlu1 %598  ;;  %v636_v13 = vmul.f32 %v601_v4, %v1682_v6 }
 0x292   : > { %v1383_v7 = vpack.i.bf16 %v649_v1, %v648_v63  ;;  %v635_v8 = vmul.f32 %v599_v5, %v1667_v61 }
 0x293   : > { %v652_v17 = vmax.f32 %v636_v13, 0.0  ;;  %v663_v13 = vmul.u32 16, %v662_v2 }
 0x294   : > { %v651_v11 = vmax.f32 %v635_v8, 0.0  ;;  %1384 = vrot.lane.b32.xlu0 %v1383_v7, %s1506_s17  ;;  %v605_v15 = vpop.permute.xlu0 %604 }
 0x295   : > { %v603_v14 = vpop.permute.xlu1 %602  ;;  %v638_v20 = vmul.f32 %v605_v15, %v1692_v12 }
 0x296   : > { %v1388_v56 = vpack.i.bf16 %v651_v11, %v650_v10  ;;  %v637_v16 = vmul.f32 %v603_v14, %v1677_v3 }
 0x297   : > { %v654_v28 = vmax.f32 %v638_v20, 0.0 }
 0x298   : > { %v653_v19 = vmax.f32 %v637_v16, 0.0  ;;  %1389 = vrot.lane.b32.xlu1 %v1388_v56, %s1506_s17 }
 0x299   : > { %v607_v25 = vpop.permute.xlu1 %606 }
 0x29a   : > { %v1393_v26 = vpack.i.bf16 %v653_v19, %v652_v17  ;;  %v639_v27 = vmul.f32 %v607_v25, %v1687_v9 }
 0x29c   : > { %v655_v29 = vmax.f32 %v639_v27, 0.0  ;;  %1394 = vrot.lane.b32.xlu0 %v1393_v26, %s1506_s17 }
 0x29e   : > { %v1398_v32 = vpack.i.bf16 %v655_v29, %v654_v28 }
 0x2a0   : > { %670 = vperm.xlu0 %1403, %v640_v23   ;;  %1399 = vrot.lane.b32.xlu1 %v1398_v32, %s1506_s17 }
 0x2a4   : > { %685 = vperm.xlu0 %1403, %v643_v30   ;;  %675 = vperm.xlu1 %1404, %v641_v24  }
 0x2a8   : > { %695 = vperm.xlu0 %1403, %v645_v42   ;;  %680 = vperm.xlu1 %1404, %v642_v31  }
 0x2ac   : > { %705 = vperm.xlu0 %1403, %v647_v53   ;;  %690 = vperm.xlu1 %1404, %v644_v41  }
 0x2b0   : > { %715 = vperm.xlu0 %1403, %v649_v1   ;;  %700 = vperm.xlu1 %1404, %v646_v51  }
 0x2b4   : > { %725 = vperm.xlu0 %1403, %v651_v11   ;;  %710 = vperm.xlu1 %1404, %v648_v63   ;;  %v660_v11 = vmul.u32 16, %v657_v59 }
 0x2b8   : > { %735 = vperm.xlu0 %1403, %v653_v19   ;;  %720 = vperm.xlu1 %1404, %v650_v10   ;;  %v659_v10 = vand.u32 127, %v656_v50 }
 0x2ba   : > { %vm1798_vm2 = vcmp.ge.s32.totalorder %v659_v10, %v660_v11  ;;  %vm1802_vm3 = vcmp.lt.s32.totalorder %v659_v10, %v663_v13 }
 0x2bb   : > { %vm665_vm4 = vmand %vm1798_vm2, %vm1802_vm3 }
 0x2bc   : > { %745 = vperm.xlu0 %1403, %v655_v29   ;;  %730 = vperm.xlu1 %1404, %v652_v17  }
 0x2c0   : > { %740 = vperm.xlu1 %1404, %v654_v28  }
 0x2f5   : > { %v1365_v23 = vpop.permute.xlu0 %1364 }
 0x2f6   : > { %v1367_v35 = vunpack.i.h.bf16 %v1365_v23  ;;  %v1366_v36 = vunpack.i.l.bf16 %v1365_v23 }
 0x2f8   : > { %v1293_v30 = vpack.c.bf16 %v1367_v35, %v1366_v36 }
 0x2fa   : > { %v1370_v38 = vpop.permute.xlu1 %1369  ;;  %1294 = vmatpush3.bf16.msra.mxu0 %v1293_v30 }
 0x2fb   : > { %v1372_v22 = vunpack.i.h.bf16 %v1370_v38  ;;  %v1371_v24 = vunpack.i.l.bf16 %v1370_v38  ;;  %1295 = vmatprep.subr.bf16.mxu0 %v1508_v18 }
 0x2fd   : > { %v1296_v31 = vpack.c.bf16 %v1372_v22, %v1371_v24 }
 0x2fe   : > { %v1375_v40 = vpop.permute.xlu0 %1374 }
 0x2ff   : > { %v1377_v41 = vunpack.i.h.bf16 %v1375_v40  ;;  %v1376_v42 = vunpack.i.l.bf16 %v1375_v40  ;;  %1297 = vmatpush3.bf16.msra.mxu0 %v1296_v31 }
 0x300   : > { %1298 = vmatprep.subr.bf16.mxu0 %v1508_v18 }
 0x301   : > { %v1299_v44 = vpack.c.bf16 %v1377_v41, %v1376_v42 }
 0x302   : > { %v1380_v46 = vpop.permute.xlu1 %1379 }
 0x303   : > { %v1382_v47 = vunpack.i.h.bf16 %v1380_v46  ;;  %v1381_v48 = vunpack.i.l.bf16 %v1380_v46  ;;  %1300 = vmatpush3.bf16.msra.mxu0 %v1299_v44 }
 0x304   : > { %1301 = vmatprep.subr.bf16.mxu0 %v1508_v18 }
 0x305   : > { %v1302_v51 = vpack.c.bf16 %v1382_v47, %v1381_v48 }
 0x306   : > { %v1385_v53 = vpop.permute.xlu0 %1384 }
 0x307   : > { %v1387_v54 = vunpack.i.h.bf16 %v1385_v53  ;;  %v1386_v57 = vunpack.i.l.bf16 %v1385_v53  ;;  %1303 = vmatpush3.bf16.msra.mxu0 %v1302_v51 }
 0x308   : > { %1304 = vmatprep.subr.bf16.mxu0 %v1508_v18 }
 0x309   : > { %v1305_v60 = vpack.c.bf16 %v1387_v54, %v1386_v57 }
 0x30a   : > { %v1390_v62 = vpop.permute.xlu1 %1389 }
 0x30b   : > { %v1392_v63 = vunpack.i.h.bf16 %v1390_v62  ;;  %v1391_v1 = vunpack.i.l.bf16 %v1390_v62  ;;  %1306 = vmatpush3.bf16.msra.mxu0 %v1305_v60 }
 0x30c   : > { %1307 = vmatprep.subr.bf16.mxu0 %v1508_v18 }
 0x30d   : > { %v1308_v4 = vpack.c.bf16 %v1392_v63, %v1391_v1 }
 0x30e   : > { %v1395_v5 = vpop.permute.xlu0 %1394 }
 0x30f   : > { %v1397_v7 = vunpack.i.h.bf16 %v1395_v5  ;;  %v1396_v8 = vunpack.i.l.bf16 %v1395_v5  ;;  %1309 = vmatpush3.bf16.msra.mxu0 %v1308_v4 }
 0x310   : > { %1310 = vmatprep.subr.bf16.mxu0 %v1508_v18 }
 0x311   : > { %v1311_v14 = vpack.c.bf16 %v1397_v7, %v1396_v8 }
 0x312   : > { %v1400_v15 = vpop.permute.xlu1 %1399 }
 0x313   : > { %v1402_v56 = vunpack.i.h.bf16 %v1400_v15  ;;  %v1401_v16 = vunpack.i.l.bf16 %v1400_v15  ;;  %1312 = vmatpush3.bf16.msra.mxu0 %v1311_v14 }
 0x314   : > { %1313 = vmatprep.subr.bf16.mxu0 %v1508_v18 }
 0x315   : > { %v1314_v20 = vpack.c.bf16 %v1402_v56, %v1401_v16 }
 0x317   : > { %1315 = vmatpush3.bf16.msra.mxu0 %v1314_v20 }
 0x31a   : > { %1258 = vmatmul.mubr.msk.f32.vlgmr.msra.gmra.mrb[16].mxu0 %vm665_vm4, %v1511_v21 }
 0x31f   : > { %v671_v25 = vpop.permute.xlu0 %670 }
 0x320   : > { %v748_v28 = vmul.f32 %v671_v25, %v1622_v33 }
 0x323   : > { %v676_v26 = vpop.permute.xlu1 %675  ;;  %v686_v27 = vpop.permute.xlu0 %685 }
 0x324   : > { %v749_v29 = vmul.f32 %v676_v26, %v1624_v34  ;;  %v751_v36 = vmul.f32 %v686_v27, %v1628_v37 }
 0x326   : > { %v1269_v32 = vpack.c.bf16 %v749_v29, %v748_v28 }
 0x327   : > { %v681_v23 = vpop.permute.xlu1 %680  ;;  %v696_v35 = vpop.permute.xlu0 %695 }
 0x328   : > { %v750_v30 = vmul.f32 %v681_v23, %v1631_v39  ;;  %1270 = vmatpush3.bf16.msra.mxu1 %v1269_v32  ;;  %v753_v31 = vmul.f32 %v696_v35, %v1637_v43 }
 0x329   : > { %1271 = vmatprep.subr.bf16.mxu1 %v1508_v18 }
 0x32a   : > { %v1272_v38 = vpack.c.bf16 %v751_v36, %v750_v30 }
 0x32b   : > { %v691_v22 = vpop.permute.xlu1 %690  ;;  %v706_v24 = vpop.permute.xlu0 %705 }
 0x32c   : > { %v752_v40 = vmul.f32 %v691_v22, %v1640_v45  ;;  %1273 = vmatpush3.bf16.msra.mxu1 %v1272_v38  ;;  %v755_v37 = vmul.f32 %v706_v24, %v1647_v49 }
 0x32d   : > { %1274 = vmatprep.subr.bf16.mxu1 %v1508_v18 }
 0x32e   : > { %v1275_v33 = vpack.c.bf16 %v753_v31, %v752_v40 }
 0x32f   : > { %v701_v34 = vpop.permute.xlu1 %700  ;;  %v716_v41 = vpop.permute.xlu0 %715 }
 0x330   : > { %v754_v39 = vmul.f32 %v701_v34, %v1652_v52  ;;  %1276 = vmatpush3.bf16.msra.mxu1 %v1275_v33  ;;  %v757_v43 = vmul.f32 %v716_v41, %v1657_v55 }
 0x331   : > { %1277 = vmatprep.subr.bf16.mxu1 %v1508_v18 }
 0x332   : > { %v1278_v42 = vpack.c.bf16 %v755_v37, %v754_v39 }
 0x333   : > { %v711_v44 = vpop.permute.xlu1 %710  ;;  %v726_v46 = vpop.permute.xlu0 %725 }
 0x334   : > { %v756_v45 = vmul.f32 %v711_v44, %v1662_v58  ;;  %1279 = vmatpush3.bf16.msra.mxu1 %v1278_v42  ;;  %v759_v49 = vmul.f32 %v726_v46, %v1667_v61 }
 0x335   : > { %1280 = vmatprep.subr.bf16.mxu1 %v1508_v18 }
 0x336   : > { %v1281_v47 = vpack.c.bf16 %v757_v43, %v756_v45 }
 0x337   : > { %v721_v48 = vpop.permute.xlu1 %720  ;;  %v736_v50 = vpop.permute.xlu0 %735 }
 0x338   : > { %v758_v52 = vmul.f32 %v721_v48, %v1672_v0  ;;  %1282 = vmatpush3.bf16.msra.mxu1 %v1281_v47  ;;  %v761_v54 = vmul.f32 %v736_v50, %v1677_v3  ;;  %v1512_v3 = vmov 0  }
 0x339   : > { %1283 = vmatprep.subr.bf16.mxu1 %v1508_v18  ;;  %1405 = vset.pattern.permute.xlu1 %v1512_v3 }
 0x33a   : > { %v1284_v51 = vpack.c.bf16 %v759_v49, %v758_v52  ;;  %1406 = vset.pattern.permute.xlu0 %v1512_v3 }
 0x33b   : > { %v731_v53 = vpop.permute.xlu1 %730  ;;  %v746_v58 = vpop.permute.xlu0 %745 }
 0x33c   : > { %v760_v55 = vmul.f32 %v731_v53, %v1682_v6  ;;  %1285 = vmatpush3.bf16.msra.mxu1 %v1284_v51  ;;  %v763_v60 = vmul.f32 %v746_v58, %v1687_v9 }
 0x33d   : > { %1286 = vmatprep.subr.bf16.mxu1 %v1508_v18 }
 0x33e   : > { %v1287_v57 = vpack.c.bf16 %v761_v54, %v760_v55 }
 0x33f   : > { %v741_v59 = vpop.permute.xlu1 %740 }
 0x340   : > { %v762_v61 = vmul.f32 %v741_v59, %v1692_v12  ;;  %1288 = vmatpush3.bf16.msra.mxu1 %v1287_v57 }
 0x341   : > { %1289 = vmatprep.subr.bf16.mxu1 %v1508_v18 }
 0x342   : > { %v1290_v0 = vpack.c.bf16 %v763_v60, %v762_v61 }
 0x344   : > { %1291 = vmatpush3.bf16.msra.mxu1 %v1290_v0 }
 0x347   : > { %1223 = vmatmul.mubr.msk.f32.vlgmr.msra.gmra.mrb[0].mxu1 %vm665_vm4, %v1511_v21 }
 0x3ed   : > { %v948_v6 = vpop.f32.mrb[16].mxu0 }
 0x3ee   : > { %v949_v9 = vadd.f32 1.1920929e-07, %v948_v6  ;;  %v1259_v62 = vpop.f32.mrb[17].mxu0 }
 0x3f0   : > { %1439 = vrcp.f32 %v949_v9 }
 0x3fa   : > { %v1440_v12 = vpop.eup %1439 }
 0x3fb   : > { %955 = vperm.xlu1 %1405, %v1440_v12  }
 0x41a   : > { %v830_v18 = vpop.f32.mrb[0].mxu1 }
 0x41b   : > { %v1224_v63 = vpop.f32.mrb[1].mxu1 }
 0x47a   : > { %v956_v1 = vpop.permute.xlu1 %955 }
 0x47b   : > { %v958_v2 = vmul.f32 %v956_v1, %v830_v18 }
 0x47d   : > { %959 = vst.msk [vmem:[%s137_s24] sm:$0xff] %vm185_vm0, %v958_v2 }
 0x47e   : > { %1454 = shalt.err (!%p1451_p3)
}
 0x47f   : > { %s1455_s5 = scalar_lea.hbm %s1848_s28, 128  ;;  %s1459_s8 = scalar_lea.hbm %s1893_s2, 256 }
 0x480   : > { %p1456_p4 = scmp.ne.s32.totalorder %s1848_s28, %s1455_s5  ;;  %p1460_p9 = scmp.lt.u32.totalorder %s1848_s28, %s1893_s2 }
 0x481   : > { %p1461_p10 = scmp.lt.u32.totalorder %s1459_s8, %s1455_s5  ;;  %p1463_p12 = scmp.lt.u32.totalorder %s1455_s5, %s1848_s28 }
 0x482   : > { %p1457_p7 = pnand %p1456_p4, %p1567_p5 }
 0x483   : > { %p1462_p11 = por %p1461_p10, %p1460_p9 }
 0x484   : > { %p1458_p8 = pneg %p1457_p7 }
 0x485   : > { %p1464_p13 = por %p1463_p12, %p1462_p11 }
 0x487   : > { %p1465_p0 = pnand %p1464_p13, %p1458_p8 }
 0x489   : > { %1468 = shalt.err (!%p1465_p0)
}
 0x48a   : > { %1316 = dma.vmem_to_hbm [thread:$0]  (%p1567_p5), %s1850_s25, 128, %s1848_s28, %s961_s29  }
 0x48b PF: > { %p1322_p1 = scmp.ge.s32.totalorder %s1503_s12, 2  ;;  %s986_s17 = sand.u32 1, %s1491_s9  }
 0x48c   : > { %s987_s21 = scalar_lea.sflag [#allocation3], %s986_s17 }
 0x48d   : > { %p1319_p2 = pnand %p1322_p1, %p1571_p6 }
 0x48f   : > { %1486 = dma.done.wait (!%p1319_p2), %s987_s21, 128  }
 0x490   : > { %1488 = vsyncadd (!%p1319_p2), %s987_s21, 4294967168  ;;  %p12_p3 = scmp.ge.s32.totalorder %s1554_s15, 4   ;;  %s1900_s9 = smov %s1495_s10 }
 0x491   : > { %s1901_s10 = smov %s1499_s11  ;;  %s1902_s11 = smov %s1565_s18 }
 0x492   : > { %s1903_s12 = smov %s1554_s15  ;;  %14 = sbr.rel (!%p12_p3) target bundleno = 3 (0x3), region = 63 }
 0x499   :  { %992 = vsyncpa [#allocation3], 1 }
 0x49a   :  { %994 = vsyncpa [#allocation3 + $0x1], 1 }

</bundles_post_ra>
